<compile_context>
chip_gen: v6e
topology: v6e:2x2x1
jax: 0.10.0
libtpu: 0.0.40
codegen_flags: <defaults>
</compile_context>

<pallas_src>
import functools

import jax
import jax.numpy as jnp
from jax.experimental import pallas as pl
from jax.experimental.pallas import tpu as pltpu


def _ffblock_kernel(Bt, H, W, Cin, Cout, NCLS,
                    x_ref, wband_ref, bias_ref, gamma_ref, beta_ref,
                    wcomb_ref, ba_ref, xn_ref, g_ref):
    Hp, Wp = H // 2, W // 2
    WC = Wp * Cout                 # lane-dense width of the pooled map (=128)
    Kb = (W + 2) * Cin             # banded-matmul contraction dim (=72)

    x = x_ref[...]                 # (Bt, 2, (H+2)//2, Kb) parity-split padded input
    wband = wband_ref[...]         # (3, Kb, 2*WC)

    # The 4 distinct (row-parity, start) windows used by the (dy, hy) loops.
    lhs = {}
    for p in range(2):
        for a in range(2):
            lhs[(p, a)] = x[:, p, a:a + Hp, :].reshape(Bt * Hp, Kb)

    # --- Conv3x3 as banded MXU matmuls; 2x2 MaxPool via phase ordering -------
    # Rows are (b, i) with h = 2i+hy; columns are (wx, j, o) with w = 2j+wx.
    yh = []
    for hy in range(2):
        acc = None
        for dy in range(3):
            r = hy + dy
            part = jnp.dot(lhs[(r % 2, r // 2)], wband[dy],
                           preferred_element_type=jnp.float32)   # (Bt*Hp, 2*WC)
            acc = part if acc is None else acc + part
        yh.append(jnp.maximum(acc[:, :WC], acc[:, WC:]))          # max over wx
    y = jnp.maximum(yh[0], yh[1])                                 # max over hy

    # bias + ReLU after the pool (exact: per-channel bias, monotone ReLU).
    y = jnp.maximum(y + bias_ref[...], 0.0)                       # (Bt*Hp, WC)
    y3 = y.reshape(Bt, Hp, WC)

    # --- GroupNorm(1, Cout): per-sample stats, two-pass (matches torch) ------
    n = Hp * WC
    mean = jnp.sum(y3, axis=(1, 2), keepdims=True) * (1.0 / n)    # (Bt,1,1)
    cent = y3 - mean
    var = jnp.sum(cent * cent, axis=(1, 2), keepdims=True) * (1.0 / n)
    inv = jax.lax.rsqrt(var + 1e-5)
    yn = cent * inv * gamma_ref[...] + beta_ref[...]               # (Bt,Hp,WC)
    xn_ref[...] = yn.astype(xn_ref.dtype)

    # --- aux Conv2d(1x1) + spatial mean: sublane sum, then comb matmul -------
    ynsum = jnp.sum(yn, axis=1)                                    # (Bt, WC)
    g = jnp.dot(ynsum, wcomb_ref[...],
                preferred_element_type=jnp.float32) + ba_ref[...]  # (Bt, NCLS)
    g_ref[...] = g.reshape(Bt, 1, NCLS).astype(g_ref.dtype)


def ffblock_forward(x_nchw, params, *, btile=64):
    """Pallas FFBlock forward. Returns (x_norm_nhwc, g)."""
    B, Cin, H, W = x_nchw.shape
    assert H % 2 == 0 and W % 2 == 0, "MaxPool2d(2) needs even H, W"
    Cout = params["b"].shape[0]
    NCLS = params["ba"].shape[0]
    Hp, Wp = H // 2, W // 2
    WC = Wp * Cout
    Kb = (W + 2) * Cin
    Hh = (H + 2) // 2              # padded rows per parity

    # ---- layout glue (plain JAX; no data blow-up in HBM) --------------------
    x_nhwc = jnp.transpose(x_nchw, (0, 2, 3, 1))
    xp = jnp.pad(x_nhwc, ((0, 0), (1, 1), (1, 1), (0, 0)))
    xr = xp.reshape(B, H + 2, Kb)
    # split rows by parity: kernel then only needs contiguous sublane windows
    xps = xr.reshape(B, Hh, 2, Kb).transpose(0, 2, 1, 3)           # (B,2,Hh,Kb)

    # ---- banded (block-Toeplitz) conv weights, pool-phase column order ------
    w = params["w"]                                                # (Cout,Cin,3,3)
    eye = jnp.eye(W, dtype=w.dtype)
    bands = []
    for dy in range(3):
        band = jnp.zeros((Kb, W * Cout), w.dtype)
        for kx in range(3):
            blk = jnp.kron(eye, jnp.transpose(w[:, :, dy, kx]))    # (W*Cin, W*Cout)
            band = band + jnp.pad(blk, ((kx * Cin, (2 - kx) * Cin), (0, 0)))
        # columns (w, o) -> (wx, j, o) with w = 2j + wx (pool-phase ordering)
        band = band.reshape(Kb, Wp, 2, Cout).transpose(0, 2, 1, 3).reshape(Kb, 2 * WC)
        bands.append(band)
    wband = jnp.stack(bands)                                       # (3, Kb, 2*WC)

    # parameters pre-tiled to the lane-dense (j, o) layout
    bias_t = jnp.tile(params["b"], Wp).reshape(1, WC)
    gamma_t = jnp.tile(params["gamma"], Wp).reshape(1, 1, WC)
    beta_t = jnp.tile(params["beta"], Wp).reshape(1, 1, WC)
    wa = params["wa"].reshape(NCLS, Cout)
    wcomb = jnp.tile(jnp.transpose(wa), (Wp, 1)) * (1.0 / (Hp * Wp))  # (WC, NCLS)
    ba = params["ba"].reshape(1, NCLS)

    # ---- batch tiling: >=2 grid steps (v7x megacore), pad batch if needed ---
    Bt = max(1, min(btile, B // 2)) if B >= 2 else 1
    nsteps = pl.cdiv(B, Bt)
    Bp = nsteps * Bt
    if Bp != B:
        xps = jnp.pad(xps, ((0, Bp - B), (0, 0), (0, 0), (0, 0)))

    kernel = functools.partial(_ffblock_kernel, Bt, H, W, Cin, Cout, NCLS)

    xn_d, g3 = pl.pallas_call(
        kernel,
        out_shape=(
            jax.ShapeDtypeStruct((Bp, Hp, WC), jnp.float32),
            jax.ShapeDtypeStruct((Bp, 1, NCLS), jnp.float32),
        ),
        grid_spec=pltpu.PrefetchScalarGridSpec(
            num_scalar_prefetch=0,
            grid=(nsteps,),
            in_specs=[
                pl.BlockSpec((Bt, 2, Hh, Kb), lambda i: (i, 0, 0, 0)),
                pl.BlockSpec((3, Kb, 2 * WC), lambda i: (0, 0, 0)),
                pl.BlockSpec((1, WC), lambda i: (0, 0)),
                pl.BlockSpec((1, 1, WC), lambda i: (0, 0, 0)),
                pl.BlockSpec((1, 1, WC), lambda i: (0, 0, 0)),
                pl.BlockSpec((WC, NCLS), lambda i: (0, 0)),
                pl.BlockSpec((1, NCLS), lambda i: (0, 0)),
            ],
            out_specs=[
                pl.BlockSpec((Bt, Hp, WC), lambda i: (i, 0, 0)),
                pl.BlockSpec((Bt, 1, NCLS), lambda i: (i, 0, 0)),
            ],
        ),
        compiler_params=pltpu.CompilerParams(
            dimension_semantics=("parallel",),
            vmem_limit_bytes=32 * 1024 * 1024,
        ),
    )(xps, wband, bias_t, gamma_t, beta_t, wcomb, ba)

    xn = xn_d[:B].reshape(B, Hp, Wp, Cout)   # back to NHWC
    g = g3[:B, 0, :]
    return xn, g


def ffblock_reference(x_nchw, params):
    """Pure-JAX NCHW reference mirroring the PyTorch module."""
    y = jax.lax.conv_general_dilated(
        x_nchw, params["w"], window_strides=(1, 1), padding=((1, 1), (1, 1)),
        dimension_numbers=("NCHW", "OIHW", "NCHW"))
    y = y + params["b"][None, :, None, None]
    y = jnp.maximum(y, 0.0)
    B, C, H, W = y.shape
    y = y.reshape(B, C, H // 2, 2, W // 2, 2).max(axis=(3, 5))
    mean = y.mean(axis=(1, 2, 3), keepdims=True)
    var = ((y - mean) ** 2).mean(axis=(1, 2, 3), keepdims=True)
    yn = (y - mean) / jnp.sqrt(var + 1e-5)
    yn = (yn * params["gamma"][None, :, None, None]
          + params["beta"][None, :, None, None])
    wa = params["wa"].reshape(-1, C)
    g = (jnp.einsum("bchw,kc->bk", yn, wa) / (yn.shape[2] * yn.shape[3])
         + params["ba"][None, :])
    return yn, g


if __name__ == "__main__":
    B, Cin, H, W = 2, 4, 16, 16        # small shapes consistent with the module
    Cout, NCLS = 16, 10

    key = jax.random.PRNGKey(0)
    ks = jax.random.split(key, 7)
    x = jax.random.normal(ks[0], (B, Cin, H, W), jnp.float32)

    fan_in = Cin * 9
    params = {
        # nn.Conv2d(in_ch, out_ch, 3, padding=1): weight (Cout,Cin,3,3), bias (Cout,)
        "w": jax.random.uniform(ks[1], (Cout, Cin, 3, 3), jnp.float32,
                                -1.0, 1.0) / jnp.sqrt(fan_in),
        "b": jax.random.uniform(ks[2], (Cout,), jnp.float32,
                                -1.0, 1.0) / jnp.sqrt(fan_in),
        # nn.GroupNorm(1, out_ch) affine params (Cout,)
        "gamma": 1.0 + 0.1 * jax.random.normal(ks[3], (Cout,), jnp.float32),
        "beta": 0.1 * jax.random.normal(ks[4], (Cout,), jnp.float32),
        # nn.Conv2d(out_ch, 10, 1): weight (10,Cout,1,1), bias (10,)
        "wa": jax.random.uniform(ks[5], (NCLS, Cout, 1, 1), jnp.float32,
                                 -1.0, 1.0) / jnp.sqrt(Cout),
        "ba": jax.random.uniform(ks[6], (NCLS,), jnp.float32,
                                 -1.0, 1.0) / jnp.sqrt(Cout),
    }

    xn, g = ffblock_forward(x, params)
    jax.block_until_ready((xn, g))

    yn_ref, g_ref = ffblock_reference(x, params)
    xn_ref_nhwc = jnp.transpose(yn_ref, (0, 2, 3, 1))
    assert jnp.allclose(xn, xn_ref_nhwc, atol=2e-3, rtol=2e-3)
    assert jnp.allclose(g, g_ref, atol=2e-3, rtol=2e-3)

    print("KERNEL_OK")
</pallas_src>

<mosaic_0001>
module attributes {stable_mosaic.version = 11 : i64} {
  func.func @_ffblock_kernel(%arg0: i32, %arg1: memref<1x2x9x72xf32, #tpu.memory_space<vmem>>, %arg2: memref<3x72x256xf32, #tpu.memory_space<vmem>>, %arg3: memref<1x128xf32, #tpu.memory_space<vmem>>, %arg4: memref<1x1x128xf32, #tpu.memory_space<vmem>>, %arg5: memref<1x1x128xf32, #tpu.memory_space<vmem>>, %arg6: memref<128x10xf32, #tpu.memory_space<vmem>>, %arg7: memref<1x10xf32, #tpu.memory_space<vmem>>, %arg8: memref<1x8x128xf32, #tpu.memory_space<vmem>>, %arg9: memref<1x1x10xf32, #tpu.memory_space<vmem>>) attributes {dimension_semantics = [#tpu.dimension_semantics<parallel>], iteration_bounds = array<i64: 2>, scalar_prefetch = 0 : i64, scratch_operands = 0 : i64, tpu.core_type = #tpu.core_type<tc>, window_params = [{transform_indices = @transform_0, window_bounds = array<i64: 1, 2, 9, 72>}, {pipeline_mode = #tpu.pipeline_mode<synchronous>, transform_indices = @transform_1, window_bounds = array<i64: 3, 72, 256>}, {pipeline_mode = #tpu.pipeline_mode<synchronous>, transform_indices = @transform_2, window_bounds = array<i64: 1, 128>}, {pipeline_mode = #tpu.pipeline_mode<synchronous>, transform_indices = @transform_3, window_bounds = array<i64: 1, 1, 128>}, {pipeline_mode = #tpu.pipeline_mode<synchronous>, transform_indices = @transform_4, window_bounds = array<i64: 1, 1, 128>}, {pipeline_mode = #tpu.pipeline_mode<synchronous>, transform_indices = @transform_5, window_bounds = array<i64: 128, 10>}, {pipeline_mode = #tpu.pipeline_mode<synchronous>, transform_indices = @transform_6, window_bounds = array<i64: 1, 10>}, {transform_indices = @transform_7, window_bounds = array<i64: 1, 8, 128>}, {transform_indices = @transform_8, window_bounds = array<i64: 1, 1, 10>}]} {
    %c0 = arith.constant 0 : index
    %c0_0 = arith.constant 0 : index
    %c0_1 = arith.constant 0 : index
    %c0_2 = arith.constant 0 : index
    %0 = vector.load %arg1[%c0, %c0_0, %c0_1, %c0_2] : memref<1x2x9x72xf32, #tpu.memory_space<vmem>>, vector<1x2x9x72xf32>
    %c0_3 = arith.constant 0 : index
    %c0_4 = arith.constant 0 : index
    %c0_5 = arith.constant 0 : index
    %1 = vector.load %arg2[%c0_3, %c0_4, %c0_5] : memref<3x72x256xf32, #tpu.memory_space<vmem>>, vector<3x72x256xf32>
    %2 = vector.extract_strided_slice %0 {offsets = [0, 0, 0, 0], sizes = [1, 1, 8, 72], strides = [1, 1, 1, 1]} : vector<1x2x9x72xf32> to vector<1x1x8x72xf32>
    %3 = vector.shape_cast %2 : vector<1x1x8x72xf32> to vector<1x8x72xf32>
    %4 = vector.shape_cast %3 : vector<1x8x72xf32> to vector<8x72xf32>
    %5 = vector.extract_strided_slice %0 {offsets = [0, 0, 1, 0], sizes = [1, 1, 8, 72], strides = [1, 1, 1, 1]} : vector<1x2x9x72xf32> to vector<1x1x8x72xf32>
    %6 = vector.shape_cast %5 : vector<1x1x8x72xf32> to vector<1x8x72xf32>
    %7 = vector.shape_cast %6 : vector<1x8x72xf32> to vector<8x72xf32>
    %8 = vector.extract_strided_slice %0 {offsets = [0, 1, 0, 0], sizes = [1, 1, 8, 72], strides = [1, 1, 1, 1]} : vector<1x2x9x72xf32> to vector<1x1x8x72xf32>
    %9 = vector.shape_cast %8 : vector<1x1x8x72xf32> to vector<1x8x72xf32>
    %10 = vector.shape_cast %9 : vector<1x8x72xf32> to vector<8x72xf32>
    %11 = vector.extract_strided_slice %0 {offsets = [0, 1, 1, 0], sizes = [1, 1, 8, 72], strides = [1, 1, 1, 1]} : vector<1x2x9x72xf32> to vector<1x1x8x72xf32>
    %12 = vector.shape_cast %11 : vector<1x1x8x72xf32> to vector<1x8x72xf32>
    %13 = vector.shape_cast %12 : vector<1x8x72xf32> to vector<8x72xf32>
    %14 = vector.extract_strided_slice %1 {offsets = [0, 0, 0], sizes = [1, 72, 256], strides = [1, 1, 1]} : vector<3x72x256xf32> to vector<1x72x256xf32>
    %15 = vector.shape_cast %14 : vector<1x72x256xf32> to vector<72x256xf32>
    %cst = arith.constant dense<0.000000e+00> : vector<8x256xf32>
    %16 = tpu.matmul %4, %15, %cst {dimension_numbers = #tpu.dot_dimension_numbers<[1], [0], [0], [1], [0, 0, 1, 1], [], []>} : vector<8x72xf32>, vector<72x256xf32>, vector<8x256xf32> -> vector<8x256xf32>
    %17 = vector.extract_strided_slice %1 {offsets = [1, 0, 0], sizes = [1, 72, 256], strides = [1, 1, 1]} : vector<3x72x256xf32> to vector<1x72x256xf32>
    %18 = vector.shape_cast %17 : vector<1x72x256xf32> to vector<72x256xf32>
    %cst_6 = arith.constant dense<0.000000e+00> : vector<8x256xf32>
    %19 = tpu.matmul %10, %18, %cst_6 {dimension_numbers = #tpu.dot_dimension_numbers<[1], [0], [0], [1], [0, 0, 1, 1], [], []>} : vector<8x72xf32>, vector<72x256xf32>, vector<8x256xf32> -> vector<8x256xf32>
    %20 = arith.addf %16, %19 : vector<8x256xf32>
    %21 = vector.extract_strided_slice %1 {offsets = [2, 0, 0], sizes = [1, 72, 256], strides = [1, 1, 1]} : vector<3x72x256xf32> to vector<1x72x256xf32>
    %22 = vector.shape_cast %21 : vector<1x72x256xf32> to vector<72x256xf32>
    %cst_7 = arith.constant dense<0.000000e+00> : vector<8x256xf32>
    %23 = tpu.matmul %7, %22, %cst_7 {dimension_numbers = #tpu.dot_dimension_numbers<[1], [0], [0], [1], [0, 0, 1, 1], [], []>} : vector<8x72xf32>, vector<72x256xf32>, vector<8x256xf32> -> vector<8x256xf32>
    %24 = arith.addf %20, %23 : vector<8x256xf32>
    %25 = vector.extract_strided_slice %24 {offsets = [0, 0], sizes = [8, 128], strides = [1, 1]} : vector<8x256xf32> to vector<8x128xf32>
    %26 = vector.extract_strided_slice %24 {offsets = [0, 128], sizes = [8, 128], strides = [1, 1]} : vector<8x256xf32> to vector<8x128xf32>
    %27 = arith.maximumf %25, %26 : vector<8x128xf32>
    %28 = vector.extract_strided_slice %1 {offsets = [0, 0, 0], sizes = [1, 72, 256], strides = [1, 1, 1]} : vector<3x72x256xf32> to vector<1x72x256xf32>
    %29 = vector.shape_cast %28 : vector<1x72x256xf32> to vector<72x256xf32>
    %cst_8 = arith.constant dense<0.000000e+00> : vector<8x256xf32>
    %30 = tpu.matmul %10, %29, %cst_8 {dimension_numbers = #tpu.dot_dimension_numbers<[1], [0], [0], [1], [0, 0, 1, 1], [], []>} : vector<8x72xf32>, vector<72x256xf32>, vector<8x256xf32> -> vector<8x256xf32>
    %31 = vector.extract_strided_slice %1 {offsets = [1, 0, 0], sizes = [1, 72, 256], strides = [1, 1, 1]} : vector<3x72x256xf32> to vector<1x72x256xf32>
    %32 = vector.shape_cast %31 : vector<1x72x256xf32> to vector<72x256xf32>
    %cst_9 = arith.constant dense<0.000000e+00> : vector<8x256xf32>
    %33 = tpu.matmul %7, %32, %cst_9 {dimension_numbers = #tpu.dot_dimension_numbers<[1], [0], [0], [1], [0, 0, 1, 1], [], []>} : vector<8x72xf32>, vector<72x256xf32>, vector<8x256xf32> -> vector<8x256xf32>
    %34 = arith.addf %30, %33 : vector<8x256xf32>
    %35 = vector.extract_strided_slice %1 {offsets = [2, 0, 0], sizes = [1, 72, 256], strides = [1, 1, 1]} : vector<3x72x256xf32> to vector<1x72x256xf32>
    %36 = vector.shape_cast %35 : vector<1x72x256xf32> to vector<72x256xf32>
    %cst_10 = arith.constant dense<0.000000e+00> : vector<8x256xf32>
    %37 = tpu.matmul %13, %36, %cst_10 {dimension_numbers = #tpu.dot_dimension_numbers<[1], [0], [0], [1], [0, 0, 1, 1], [], []>} : vector<8x72xf32>, vector<72x256xf32>, vector<8x256xf32> -> vector<8x256xf32>
    %38 = arith.addf %34, %37 : vector<8x256xf32>
    %39 = vector.extract_strided_slice %38 {offsets = [0, 0], sizes = [8, 128], strides = [1, 1]} : vector<8x256xf32> to vector<8x128xf32>
    %40 = vector.extract_strided_slice %38 {offsets = [0, 128], sizes = [8, 128], strides = [1, 1]} : vector<8x256xf32> to vector<8x128xf32>
    %41 = arith.maximumf %39, %40 : vector<8x128xf32>
    %42 = arith.maximumf %27, %41 : vector<8x128xf32>
    %c0_11 = arith.constant 0 : index
    %c0_12 = arith.constant 0 : index
    %43 = vector.load %arg3[%c0_11, %c0_12] : memref<1x128xf32, #tpu.memory_space<vmem>>, vector<1x128xf32>
    %44 = vector.broadcast %43 : vector<1x128xf32> to vector<8x128xf32>
    %45 = arith.addf %42, %44 : vector<8x128xf32>
    %cst_13 = arith.constant 0.000000e+00 : f32
    %46 = vector.broadcast %cst_13 : f32 to vector<8x128xf32>
    %47 = arith.maximumf %45, %46 : vector<8x128xf32>
    %48 = vector.shape_cast %47 : vector<8x128xf32> to vector<1x8x128xf32>
    %cst_14 = arith.constant dense<0.000000e+00> : vector<1xf32>
    %49 = vector.multi_reduction <add>, %48, %cst_14 [1, 2] : vector<1x8x128xf32> to vector<1xf32>
    %50 = vector.shape_cast %49 : vector<1xf32> to vector<1x1x1xf32>
    %cst_15 = arith.constant 9.765625E-4 : f32
    %51 = vector.broadcast %cst_15 : f32 to vector<1x1x1xf32>
    %52 = arith.mulf %50, %51 : vector<1x1x1xf32>
    %53 = vector.broadcast %52 : vector<1x1x1xf32> to vector<1x8x128xf32>
    %54 = arith.subf %48, %53 : vector<1x8x128xf32>
    %55 = arith.mulf %54, %54 : vector<1x8x128xf32>
    %cst_16 = arith.constant dense<0.000000e+00> : vector<1xf32>
    %56 = vector.multi_reduction <add>, %55, %cst_16 [1, 2] : vector<1x8x128xf32> to vector<1xf32>
    %57 = vector.shape_cast %56 : vector<1xf32> to vector<1x1x1xf32>
    %cst_17 = arith.constant 9.765625E-4 : f32
    %58 = vector.broadcast %cst_17 : f32 to vector<1x1x1xf32>
    %59 = arith.mulf %57, %58 : vector<1x1x1xf32>
    %cst_18 = arith.constant 9.99999974E-6 : f32
    %60 = vector.broadcast %cst_18 : f32 to vector<1x1x1xf32>
    %61 = arith.addf %59, %60 : vector<1x1x1xf32>
    %62 = math.rsqrt %61 : vector<1x1x1xf32>
    %63 = vector.broadcast %62 : vector<1x1x1xf32> to vector<1x8x128xf32>
    %64 = arith.mulf %54, %63 : vector<1x8x128xf32>
    %c0_19 = arith.constant 0 : index
    %c0_20 = arith.constant 0 : index
    %c0_21 = arith.constant 0 : index
    %65 = vector.load %arg4[%c0_19, %c0_20, %c0_21] : memref<1x1x128xf32, #tpu.memory_space<vmem>>, vector<1x1x128xf32>
    %66 = vector.broadcast %65 : vector<1x1x128xf32> to vector<1x8x128xf32>
    %67 = arith.mulf %64, %66 : vector<1x8x128xf32>
    %c0_22 = arith.constant 0 : index
    %c0_23 = arith.constant 0 : index
    %c0_24 = arith.constant 0 : index
    %68 = vector.load %arg5[%c0_22, %c0_23, %c0_24] : memref<1x1x128xf32, #tpu.memory_space<vmem>>, vector<1x1x128xf32>
    %69 = vector.broadcast %68 : vector<1x1x128xf32> to vector<1x8x128xf32>
    %70 = arith.addf %67, %69 : vector<1x8x128xf32>
    %c0_25 = arith.constant 0 : index
    %c0_26 = arith.constant 0 : index
    %c0_27 = arith.constant 0 : index
    %71 = vector.load %arg8[%c0_25, %c0_26, %c0_27] : memref<1x8x128xf32, #tpu.memory_space<vmem>>, vector<1x8x128xf32>
    tpu.vector_store %arg8[%c0_25, %c0_26, %c0_27], %70 {strides = array<i32>} : memref<1x8x128xf32, #tpu.memory_space<vmem>>, vector<1x8x128xf32>,
    %cst_28 = arith.constant dense<0.000000e+00> : vector<1x128xf32>
    %72 = vector.multi_reduction <add>, %70, %cst_28 [1] : vector<1x8x128xf32> to vector<1x128xf32>
    %c0_29 = arith.constant 0 : index
    %c0_30 = arith.constant 0 : index
    %73 = vector.load %arg6[%c0_29, %c0_30] : memref<128x10xf32, #tpu.memory_space<vmem>>, vector<128x10xf32>
    %cst_31 = arith.constant dense<0.000000e+00> : vector<1x10xf32>
    %74 = tpu.matmul %72, %73, %cst_31 {dimension_numbers = #tpu.dot_dimension_numbers<[1], [0], [0], [1], [0, 0, 1, 1], [], []>} : vector<1x128xf32>, vector<128x10xf32>, vector<1x10xf32> -> vector<1x10xf32>
    %c0_32 = arith.constant 0 : index
    %c0_33 = arith.constant 0 : index
    %75 = vector.load %arg7[%c0_32, %c0_33] : memref<1x10xf32, #tpu.memory_space<vmem>>, vector<1x10xf32>
    %76 = arith.addf %74, %75 : vector<1x10xf32>
    %77 = vector.shape_cast %76 : vector<1x10xf32> to vector<1x1x10xf32>
    %c0_34 = arith.constant 0 : index
    %c0_35 = arith.constant 0 : index
    %c0_36 = arith.constant 0 : index
    %78 = vector.load %arg9[%c0_34, %c0_35, %c0_36] : memref<1x1x10xf32, #tpu.memory_space<vmem>>, vector<1x1x10xf32>
    tpu.vector_store %arg9[%c0_34, %c0_35, %c0_36], %77 {strides = array<i32>} : memref<1x1x10xf32, #tpu.memory_space<vmem>>, vector<1x1x10xf32>,
    return
  }
  func.func @transform_0(%arg0: i32) -> (i32, i32, i32, i32) {
    %c0_i32 = arith.constant 0 : i32
    %c0_i32_0 = arith.constant 0 : i32
    %c0_i32_1 = arith.constant 0 : i32
    %c0_i32_2 = arith.constant 0 : i32
    return %arg0, %c0_i32, %c0_i32_0, %c0_i32_1 : i32, i32, i32, i32
  }
  func.func @transform_1(%arg0: i32) -> (i32, i32, i32) {
    %c0_i32 = arith.constant 0 : i32
    %c0_i32_0 = arith.constant 0 : i32
    %c0_i32_1 = arith.constant 0 : i32
    %c0_i32_2 = arith.constant 0 : i32
    return %c0_i32, %c0_i32_0, %c0_i32_1 : i32, i32, i32
  }
  func.func @transform_2(%arg0: i32) -> (i32, i32) {
    %c0_i32 = arith.constant 0 : i32
    %c0_i32_0 = arith.constant 0 : i32
    %c0_i32_1 = arith.constant 0 : i32
    return %c0_i32, %c0_i32_0 : i32, i32
  }
  func.func @transform_3(%arg0: i32) -> (i32, i32, i32) {
    %c0_i32 = arith.constant 0 : i32
    %c0_i32_0 = arith.constant 0 : i32
    %c0_i32_1 = arith.constant 0 : i32
    %c0_i32_2 = arith.constant 0 : i32
    return %c0_i32, %c0_i32_0, %c0_i32_1 : i32, i32, i32
  }
  func.func @transform_4(%arg0: i32) -> (i32, i32, i32) {
    %c0_i32 = arith.constant 0 : i32
    %c0_i32_0 = arith.constant 0 : i32
    %c0_i32_1 = arith.constant 0 : i32
    %c0_i32_2 = arith.constant 0 : i32
    return %c0_i32, %c0_i32_0, %c0_i32_1 : i32, i32, i32
  }
  func.func @transform_5(%arg0: i32) -> (i32, i32) {
    %c0_i32 = arith.constant 0 : i32
    %c0_i32_0 = arith.constant 0 : i32
    %c0_i32_1 = arith.constant 0 : i32
    return %c0_i32, %c0_i32_0 : i32, i32
  }
  func.func @transform_6(%arg0: i32) -> (i32, i32) {
    %c0_i32 = arith.constant 0 : i32
    %c0_i32_0 = arith.constant 0 : i32
    %c0_i32_1 = arith.constant 0 : i32
    return %c0_i32, %c0_i32_0 : i32, i32
  }
  func.func @transform_7(%arg0: i32) -> (i32, i32, i32) {
    %c0_i32 = arith.constant 0 : i32
    %c0_i32_0 = arith.constant 0 : i32
    %c0_i32_1 = arith.constant 0 : i32
    return %arg0, %c0_i32, %c0_i32_0 : i32, i32, i32
  }
  func.func @transform_8(%arg0: i32) -> (i32, i32, i32) {
    %c0_i32 = arith.constant 0 : i32
    %c0_i32_0 = arith.constant 0 : i32
    %c0_i32_1 = arith.constant 0 : i32
    return %arg0, %c0_i32, %c0_i32_0 : i32, i32, i32
  }
}

</mosaic_0001>

<bundles_post_ra>
// kernel: tpu_custom_call.1
= control target key start
LH: loop header
LB: loop body
LE: loop exit
PB: predicated region body
PF: predicated region fallthrough
CT: control target
= control target key end

     0   :  { %s1816_s0 = inlined_call_operand.vmem [shape: f32[2,2,9,72], index: 0, kind: input, shape index: {}]   ;;  %s1817_s1 = inlined_call_operand.hbm [shape: f32[3,72,256], index: 1, kind: input, shape index: {}]   ;;  %s1818_s2 = inlined_call_operand.vmem [shape: f32[1,128], index: 2, kind: input, shape index: {}]   ;;  %s1819_s3 = inlined_call_operand.vmem [shape: f32[1,1,128], index: 3, kind: input, shape index: {}]   ;;  %s1820_s4 = inlined_call_operand.vmem [shape: f32[1,1,128], index: 4, kind: input, shape index: {}]   ;;  %s1821_s5 = inlined_call_operand.vmem [shape: f32[128,10], index: 5, kind: input, shape index: {}]   ;;  %s1822_s6 = inlined_call_operand.vmem [shape: f32[1,10], index: 6, kind: input, shape index: {}]   ;;  %s1823_s7 = inlined_call_operand.hbm [shape: f32[2,8,128], index: 7, kind: output, shape index: {0}]   ;;  %s1824_s8 = inlined_call_operand.hbm [shape: f32[2,1,10], index: 8, kind: output, shape index: {1}]  }
   0x1   :  { %1825 = sst [smem:[#allocation11_spill]] %s1816_s0 }
   0x2   :  { %14 = vsyncpa [#allocation3], 0 }
   0x3   :  { %15 = vsyncpa [#allocation4], 0 }
   0x4   :  { %17 = vsyncpa [#allocation4 + $0x1], 0 }
   0x5   :  { %18 = vsyncpa [#allocation7], 0 }
   0x6   :  { %20 = vsyncpa [#allocation7 + $0x1], 0  ;;  %s1425_s27 = smov 0   ;;  %s1427_s28 = smov 0  }
   0x7   :  { %s1429_s29 = smov 0   ;;  %s1431_s30 = smov 0  }
   0x8 LB: > { %s1446_s9 = sadd.s32 4294967295, %s1371_s30   ;;  %s1114_s10 = sadd.s32 4294967294, %s1371_s30   ;;  %s1371_s30 = sphi %s1431_s30, %s1834_s30   ;;  %s1367_s29 = sphi %s1429_s29, %s1833_s29   ;;  %s1363_s28 = sphi %s1427_s28, %s1832_s28   ;;  %s1359_s27 = sphi %s1425_s27, %s1831_s27  }
   0x9   : > { %s1450_s11 = sadd.s32 1, %s1371_s30   ;;  %s185_s12 = sadd.s32 1, %s1367_s29 }
   0xa   : > { %s182_s13 = ssub.s32 %s1371_s30, %s1450_s11  ;;  %p195_p0 = scmp.ne.s32.totalorder %s1367_s29, %s1363_s28 }
   0xb   : > { %p183_p1 = scmp.eq.s32.totalorder %s182_s13, 0  ;;  %p196_p2 = scmp.eq.s32.totalorder %s1446_s9, 1 }
   0xc   : > { %p201_p3 = scmp.ne.s32.totalorder %s1363_s28, %s1359_s27  ;;  %p202_p4 = scmp.eq.s32.totalorder %s1114_s10, 1 }
   0xd   : > { %s1461_s14 = scalar_select %p183_p1, %s1367_s29, %s185_s12  }
   0xe   : > { %p1463_p5 = por %p196_p2, %p195_p0  ;;  %p1467_p6 = por %p202_p4, %p201_p3 }
   0xf   : > { %p1115_p7 = scmp.ge.s32.totalorder %s1371_s30, 1  ;;  %p235_p8 = scmp.lt.s32.totalorder %s1371_s30, 3 }
  0x10   : > { %s1827_s16 = scalar_select %p1467_p6, 1, 0 }
  0x11   : > { %p1209_p9 = scmp.eq.s32.totalorder %s1446_s9, 0  ;;  %p1474_p10 = pnand %p1115_p7, %p235_p8 }
  0x12   : > { %s1373_s18 = smov [#allocation2]  }
  0x13   : > { %s247_s19 = sshll.u32 %s1373_s18, 4  ;;  %p1198_p11 = pneg %p1474_p10  ;;  %s248_s19 = int_to_ptr.vmem [resolvable:$true] %s247_s19 }
  0x14   : > { %s1262_s20 = scalar_lea.vmem %s248_s19, 6912  ;;  %p1270_p3 = scmp.lt.s32.totalorder %s248_s19, %s248_s19 }
  0x15   : > { %p1199_p12 = pnand %p1209_p9, %p1198_p11  ;;  %p1263_p0 = scmp.ne.s32.totalorder %s248_s19, %s1262_s20 }
  0x16   : > { %p1271_p4 = scmp.lt.s32.totalorder %s1262_s20, %s1262_s20 }
  0x17   : > { %p1253_p13 = pneg %p1199_p12 }
  0x18   : > { %p1272_p6 = por %p1271_p4, %p1270_p3 }
  0x19   : > { %p1265_p1 = pnand %p1263_p0, %p1253_p13 }
  0x1b   : > { %p1266_p2 = pneg %p1265_p1 }
  0x1d   : > { %p1273_p7 = pnand %p1272_p6, %p1266_p2 }
  0x1f   : > { %1276 = shalt.err (!%p1273_p7)
}
  0x20   : > { %s1374_s21 = smov 256   ;;  %s1375_s22 = smov 16  }
  0x21   : > { %1201 = dma.hbm_to_vmem [thread:$0]  (!%p1199_p12), %s1817_s1, 6912, %s248_s19, [#allocation3], %s1374_s21, %s1374_s21, %s1375_s22  }
  0x22   : > { %286 = sbr.rel (%p1474_p10) target bundleno = 869 (0x365), region = 48 }
  0x27   : > { %1346 = dma.done.wait (%p1209_p9), [#allocation3], 6912  }
  0x28   : > { %1348 = vsyncadd (%p1209_p9), [#allocation3], 4294960384  ;;  %v1376_v0 = vmov 0.0   ;;  %v1493_v1 = vld [vmem:[#allocation2 + $0x118] sm:$0xff]  ;;  %v1495_v2 = vld [vmem:[#allocation2 + $0x110] sm:$0xff]  ;;  %p324_p6 = scmp.lt.s32.totalorder %s1446_s9, 1 }
  0x29   : > { %455 = vmatprep.mubr.f32.mxu1 %v1376_v0  ;;  %607 = vmatprep.mubr.f32.mxu0 %v1376_v0  ;;  %v1497_v3 = vld [vmem:[#allocation2 + $0x108] sm:$0xff]  ;;  %v1500_v4 = vld [vmem:[#allocation2 + $0x100] sm:$0xff]  ;;  %v1503_v5 = vld [vmem:[#allocation2 + $0xf8] sm:$0xff]  ;;  %s1829_s0 = sld [smem:[#allocation11_spill]]  ;;  %vm387_vm0 = vcmask 588800   ;;  %vm537_vm1 = vcmask 1046528  }
  0x2a   : > { %405 = vmatprep.subr.mxu1 %v1493_v1  ;;  %v1507_v6 = vld [vmem:[#allocation2 + $0xf0] sm:$0xff]  ;;  %v1510_v7 = vld [vmem:[#allocation2 + $0xe8] sm:$0xff]  ;;  %v1513_v8 = vld [vmem:[#allocation2 + $0xe0] sm:$0xff]  ;;  %s1519_s25 = scalar_select %p324_p6, %s1446_s9, 1  ;;  %vm1377_vm2 = vmmov 0  }
  0x2b   : > { %406 = vmatpush1.msra.mxu1 %v1495_v2  ;;  %v1516_v9 = vld [vmem:[#allocation2 + $0xd8] sm:$0xff]  ;;  %v1521_v10 = vld [vmem:[#allocation2 + $0x1a8] sm:$0xff]  ;;  %v1524_v11 = vld [vmem:[#allocation2 + $0xd0] sm:$0xff]  ;;  %s1133_s19 = sshll.u32 %s1446_s9, 7  ;;  %s1378_s10 = smov [#allocation5]  }
  0x2c   : > { %407 = vmatprep.subr.mxu1 %v1497_v3  ;;  %557 = vmatprep.subr.mxu0 %v1521_v10  ;;  %v1527_v12 = vld [vmem:[#allocation2 + $0x1a0] sm:$0xff]  ;;  %v1530_v13 = vld [vmem:[#allocation2 + $0xc8] sm:$0xff]  ;;  %v1533_v14 = vld [vmem:[#allocation2 + $0x198] sm:$0xff]  ;;  %s1137_s26 = sshll.u32 %s1519_s25, 5  ;;  %s1745_s25 = sand.u32 1, %s1363_s28  }
  0x2d   : > { %408 = vmatpush1.msra.mxu1 %v1500_v4  ;;  %558 = vmatpush1.msra.mxu0 %v1527_v12  ;;  %v1535_v15 = vld [vmem:[#allocation2 + $0x190] sm:$0xff]  ;;  %v1538_v16 = vld [vmem:[#allocation2 + $0xc0] sm:$0xff]  ;;  %v1541_v17 = vld [vmem:[#allocation2 + $0x188] sm:$0xff]  ;;  %s1120_s12 = sshll.u32 %s1745_s25, 3  ;;  %s1000_s22 = scalar_lea.hbm %s1823_s7, %s1133_s19 }
  0x2e   : > { %409 = vmatprep.subr.mxu1 %v1503_v5  ;;  %559 = vmatprep.subr.mxu0 %v1533_v14  ;;  %v1544_v18 = vld [vmem:[#allocation2 + $0xb8] sm:$0xff]  ;;  %v1548_v19 = vld [vmem:[#allocation2 + $0x180] sm:$0xff]  ;;  %v1553_v21 = vld [vmem:[#allocation2 + $0xb0] sm:$0xff]  ;;  %s317_s18 = scalar_lea.vmem [#allocation5], %s1120_s12  ;;  %s985_s24 = scalar_lea.sflag [#allocation4], %s1745_s25 }
  0x2f   : > { %410 = vmatpush1.msra.mxu1 %v1507_v6  ;;  %560 = vmatpush1.msra.mxu0 %v1535_v15  ;;  %v1550_v20 = vld [vmem:[#allocation2 + $0x178] sm:$0xff]  ;;  %v1556_v22 = vld [vmem:[#allocation2 + $0x170] sm:$0xff]  ;;  %v1559_v23 = vld [vmem:[#allocation2 + $0xa8] sm:$0xff]  ;;  %s1570_s13 = scalar_lea.vmem %s1829_s0, %s1137_s26  ;;  %s1002_s23 = sshll.u32 %s317_s18, 4  ;;  %s1003_s23 = int_to_ptr.vmem [resolvable:$true] %s1002_s23 }
  0x30   : > { %411 = vmatprep.subr.mxu1 %v1510_v7  ;;  %561 = vmatprep.subr.mxu0 %v1541_v17  ;;  %v1562_v24 = vld [vmem:[#allocation2 + $0x168] sm:$0xff]  ;;  %v1565_v25 = vld [vmem:[#allocation2 + $0xa0] sm:$0xff]  ;;  %v1576_v27 = vld [vmem:[#allocation2 + $0x98] sm:$0xff]  ;;  %s1277_s26 = scalar_lea.vmem %s1003_s23, 128  ;;  %s1281_s12 = sshll.u32 %s1378_s10, 4  ;;  %s1282_s12 = int_to_ptr.vmem [resolvable:$false] %s1281_s12 }
  0x31   : > { %412 = vmatpush1.msra.mxu1 %v1513_v8  ;;  %562 = vmatpush1.msra.mxu0 %v1548_v19  ;;  %v1573_v26 = vld [vmem:[#allocation2 + $0x160] sm:$0xff]  ;;  %v1579_v28 = vld [vmem:[#allocation2 + $0x158] sm:$0xff]  ;;  %v1582_v29 = vld [vmem:[#allocation2 + $0x90] sm:$0xff]  ;;  %p1278_p8 = scmp.ne.s32.totalorder %s1003_s23, %s1277_s26  ;;  %p1284_p11 = scmp.lt.s32.totalorder %s1003_s23, %s1282_s12 }
  0x32   : > { %413 = vmatprep.subr.mxu1 %v1516_v9  ;;  %563 = vmatprep.subr.mxu0 %v1550_v20  ;;  %v1585_v30 = vld [vmem:[#allocation2 + $0x150] sm:$0xff]  ;;  %v350_v32 = vld [vmem:[#allocation2 + $0x88] sm:$0xff]  ;;  %v349_v33 = vld [vmem:[#allocation2 + $0x80] sm:$0xff] }
  0x33   : > { %414 = vmatpush1.msra.mxu1 %v1524_v11  ;;  %564 = vmatpush1.msra.mxu0 %v1556_v22  ;;  %v1589_v31 = vld [vmem:[%s1570_s13 + $0x10] sm:$0xff]  ;;  %v348_v34 = vld [vmem:[#allocation2 + $0x78] sm:$0xff]  ;;  %v1594_v35 = vld [vmem:[#allocation2 + $0x148] sm:$0xff]  ;;  %p1279_p9 = pnand %p1278_p8, %p1463_p5 }
  0x34   : > { %415 = vmatprep.subr.mxu1 %v1530_v13  ;;  %565 = vmatprep.subr.mxu0 %v1562_v24  ;;  %v1598_v36 = vld [vmem:[#allocation2 + $0x140] sm:$0xff]  ;;  %v330_v38 = vld [vmem:[%s1570_s13 + $0x8] sm:$0x1]  ;;  %v347_v39 = vld [vmem:[#allocation2 + $0x70] sm:$0xff]  ;;  %v760_v62 = vrot.slane %v1589_v31, 1 }
  0x35   : > { %416 = vmatpush1.msra.mxu1 %v1538_v16  ;;  %566 = vmatpush1.msra.mxu0 %v1573_v26  ;;  %v329_v37 = vld [vmem:[%s1570_s13] sm:$0xff]  ;;  %v1604_v40 = vld [vmem:[#allocation2 + $0x138] sm:$0xff]  ;;  %v346_v41 = vld [vmem:[#allocation2 + $0x68] sm:$0xff]  ;;  %v539_v46 = vrot.slane %v330_v38, 1  ;;  %p1280_p10 = pneg %p1279_p9 }
  0x36   : > { %417 = vmatprep.subr.mxu1 %v1544_v18  ;;  %567 = vmatprep.subr.mxu0 %v1579_v28  ;;  %v1607_v42 = vld [vmem:[#allocation2 + $0x130] sm:$0xff]  ;;  %v345_v43 = vld [vmem:[#allocation2 + $0x60] sm:$0xff]  ;;  %v1610_v44 = vld [vmem:[#allocation2 + $0x128] sm:$0xff]  ;;  %v538_v45 = vrot.slane %v329_v37, 1 }
  0x37   : > { %418 = vmatpush1.msra.mxu1 %v1553_v21  ;;  %568 = vmatpush1.msra.mxu0 %v1585_v30  ;;  %v344_v47 = vld [vmem:[#allocation2 + $0x58] sm:$0xff]  ;;  %v343_v48 = vld [vmem:[#allocation2 + $0x50] sm:$0xff]  ;;  %v1614_v49 = vld [vmem:[#allocation2 + $0x120] sm:$0xff] }
  0x38   : > { %419 = vmatprep.subr.mxu1 %v1559_v23  ;;  %569 = vmatprep.subr.mxu0 %v1594_v35  ;;  %v342_v50 = vld [vmem:[#allocation2 + $0x48] sm:$0xff]  ;;  %v341_v51 = vld [vmem:[#allocation2 + $0x40] sm:$0xff]  ;;  %v1619_v52 = vsel %vm537_vm1, %v538_v45, %v539_v46  ;;  %v340_v53 = vld [vmem:[#allocation2 + $0x38] sm:$0xff] }
  0x39   : > { %420 = vmatpush1.msra.mxu1 %v1565_v25  ;;  %570 = vmatpush1.msra.mxu0 %v1598_v36  ;;  %v339_v54 = vld [vmem:[#allocation2 + $0x30] sm:$0xff]  ;;  %v338_v55 = vld [vmem:[#allocation2 + $0x28] sm:$0xff]  ;;  %v337_v56 = vld [vmem:[#allocation2 + $0x20] sm:$0xff] }
  0x3a   : > { %421 = vmatprep.subr.mxu1 %v1576_v27  ;;  %571 = vmatprep.subr.mxu0 %v1604_v40  ;;  %v336_v57 = vld [vmem:[#allocation2 + $0x18] sm:$0xff]  ;;  %v335_v58 = vld [vmem:[#allocation2 + $0x10] sm:$0xff]  ;;  %v334_v59 = vld [vmem:[#allocation2 + $0x8] sm:$0xff] }
  0x3b   : > { %422 = vmatpush1.msra.mxu1 %v1582_v29  ;;  %572 = vmatpush1.msra.mxu0 %v1607_v42  ;;  %v333_v60 = vld [vmem:[#allocation2] sm:$0xff]  ;;  %v332_v61 = vld [vmem:[%s1570_s13 + $0x18] sm:$0x1]  ;;  %s1283_s13 = scalar_lea.vmem %s1282_s12, 256 }
  0x3c   : > { %1123 = vmatmul.mubr.msk.f32.vlgmr.msra.gmra.mxu1 %vm387_vm0, %v1589_v31  ;;  %479 = vmatprep.subr.mxu1 %v350_v32  ;;  %v761_v63 = vrot.slane %v332_v61, 1  ;;  %v910_v38 = vld [vmem:[%s1821_s5 + $0x78] sm:$0xff]  ;;  %v903_v45 = vld [vmem:[%s1821_s5 + $0x40] sm:$0xff]  ;;  %p1285_p12 = scmp.lt.s32.totalorder %s1283_s13, %s1277_s26 }
  0x3d   : > { %480 = vmatpush1.msra.mxu1 %v349_v33  ;;  %573 = vmatprep.subr.mxu0 %v1610_v44  ;;  %v902_v46 = vld [vmem:[%s1821_s5 + $0x38] sm:$0xff] }
  0x3e   : > { %481 = vmatprep.subr.mxu1 %v348_v34  ;;  %529 = vmatprep.mubr.f32.mxu1 %v1376_v0  ;;  %p1286_p13 = por %p1285_p12, %p1284_p11 }
  0x3f   : > { %482 = vmatpush1.msra.mxu1 %v347_v39  ;;  %574 = vmatpush1.msra.mxu0 %v1614_v49 }
  0x40   : > { %483 = vmatprep.subr.mxu1 %v346_v41  ;;  %702 = vmatprep.subr.mxu0 %v350_v32  ;;  %p1287_p0 = pnand %p1286_p13, %p1280_p10 }
  0x41   : > { %484 = vmatpush1.msra.mxu1 %v345_v43  ;;  %1125 = vmatmul.mubr.msk.f32.vlgmr.msra.gmra.mxu0 %vm387_vm0, %v1619_v52 }
  0x42   : > { %485 = vmatprep.subr.mxu1 %v344_v47  ;;  %703 = vmatpush1.msra.mxu0 %v349_v33 }
  0x43   : > { %486 = vmatpush1.msra.mxu1 %v343_v48  ;;  %704 = vmatprep.subr.mxu0 %v348_v34 }
  0x44   : > { %487 = vmatprep.subr.mxu1 %v342_v50  ;;  %705 = vmatpush1.msra.mxu0 %v347_v39  ;;  %v909_v39 = vld [vmem:[%s1821_s5 + $0x70] sm:$0xff] }
  0x45   : > { %488 = vmatpush1.msra.mxu1 %v341_v51  ;;  %706 = vmatprep.subr.mxu0 %v346_v41  ;;  %v907_v41 = vld [vmem:[%s1821_s5 + $0x60] sm:$0xff] }
  0x46   : > { %489 = vmatprep.subr.mxu1 %v340_v53  ;;  %707 = vmatpush1.msra.mxu0 %v345_v43  ;;  %v905_v43 = vld [vmem:[%s1821_s5 + $0x50] sm:$0xff] }
  0x47   : > { %490 = vmatpush1.msra.mxu1 %v339_v54  ;;  %708 = vmatprep.subr.mxu0 %v344_v47  ;;  %v901_v47 = vld [vmem:[%s1821_s5 + $0x30] sm:$0xff] }
  0x48   : > { %491 = vmatprep.subr.mxu1 %v338_v55  ;;  %709 = vmatpush1.msra.mxu0 %v343_v48  ;;  %v900_v48 = vld [vmem:[%s1821_s5 + $0x28] sm:$0xff] }
  0x49   : > { %492 = vmatpush1.msra.mxu1 %v337_v56  ;;  %710 = vmatprep.subr.mxu0 %v342_v50  ;;  %v898_v50 = vld [vmem:[%s1821_s5 + $0x18] sm:$0xff] }
  0x4a   : > { %493 = vmatprep.subr.mxu1 %v336_v57  ;;  %711 = vmatpush1.msra.mxu0 %v341_v51  ;;  %v897_v51 = vld [vmem:[%s1821_s5 + $0x10] sm:$0xff] }
  0x4b   : > { %494 = vmatpush1.msra.mxu1 %v335_v58  ;;  %712 = vmatprep.subr.mxu0 %v340_v53  ;;  %v895_v53 = vld [vmem:[%s1821_s5] sm:$0xff] }
  0x4c   : > { %495 = vmatprep.subr.mxu1 %v334_v59  ;;  %713 = vmatpush1.msra.mxu0 %v339_v54 }
  0x4d   : > { %496 = vmatpush1.msra.mxu1 %v333_v60  ;;  %714 = vmatprep.subr.mxu0 %v338_v55 }
  0x4e   : > { %1124 = vmatmul.mubr.msk.f32.vlgmr.msra.gmra.mxu1 %vm387_vm0, %v329_v37  ;;  %631 = vmatprep.subr.mxu1 %v1493_v1  ;;  %v762_v1 = vsel %vm537_vm1, %v760_v62, %v761_v63 }
  0x4f   : > { %632 = vmatpush1.msra.mxu1 %v1495_v2  ;;  %715 = vmatpush1.msra.mxu0 %v337_v56 }
  0x50   : > { %633 = vmatprep.subr.mxu1 %v1497_v3  ;;  %716 = vmatprep.subr.mxu0 %v336_v57 }
  0x51   : > { %634 = vmatpush1.msra.mxu1 %v1500_v4  ;;  %717 = vmatpush1.msra.mxu0 %v335_v58 }
  0x52   : > { %635 = vmatprep.subr.mxu1 %v1503_v5  ;;  %718 = vmatprep.subr.mxu0 %v334_v59 }
  0x53   : > { %636 = vmatpush1.msra.mxu1 %v1507_v6  ;;  %681 = vmatprep.mubr.f32.mxu1 %v1376_v0 }
  0x54   : > { %637 = vmatprep.subr.mxu1 %v1510_v7  ;;  %719 = vmatpush1.msra.mxu0 %v333_v60 }
  0x55   : > { %638 = vmatpush1.msra.mxu1 %v1513_v8  ;;  %752 = vmatprep.mubr.f32.mxu0 %v1376_v0 }
  0x56   : > { %639 = vmatprep.subr.mxu1 %v1516_v9  ;;  %1127 = vmatmul.mubr.msk.f32.vlgmr.msra.gmra.mxu0 %vm387_vm0, %v1589_v31 }
  0x57   : > { %640 = vmatpush1.msra.mxu1 %v1524_v11  ;;  %1155 = vmatprep.subr.mxu0 %v1376_v0 }
  0x58   : > { %641 = vmatprep.subr.mxu1 %v1530_v13  ;;  %1156 = vmatpush3.msra.mxu0 %v910_v38 }
  0x59   : > { %642 = vmatpush1.msra.mxu1 %v1538_v16  ;;  %1187 = vmatprep.mubr.msk.f32.mxu0 %vm1377_vm2, %v1376_v0 }
  0x5a   : > { %643 = vmatprep.subr.mxu1 %v1544_v18  ;;  %1157 = vmatprep.subr.mxu0 %v1376_v0 }
  0x5b   : > { %644 = vmatpush1.msra.mxu1 %v1553_v21  ;;  %1158 = vmatpush3.msra.mxu0 %v909_v39 }
  0x5c   : > { %645 = vmatprep.subr.mxu1 %v1559_v23  ;;  %1159 = vmatprep.subr.mxu0 %v1376_v0 }
  0x5d   : > { %646 = vmatpush1.msra.mxu1 %v1565_v25 }
  0x5e   : > { %647 = vmatprep.subr.mxu1 %v1576_v27 }
  0x5f   : > { %648 = vmatpush1.msra.mxu1 %v1582_v29 }
  0x60   : > { %1126 = vmatmul.mubr.msk.f32.vlgmr.msra.gmra.mxu1 %vm387_vm0, %v1619_v52  ;;  %779 = vmatprep.subr.mxu1 %v1521_v10  ;;  %v896_v52 = vld [vmem:[%s1821_s5 + $0x8] sm:$0xff] }
  0x61   : > { %780 = vmatpush1.msra.mxu1 %v1527_v12  ;;  %829 = vmatprep.mubr.f32.mxu1 %v1376_v0 }
  0x62   : > { %781 = vmatprep.subr.mxu1 %v1533_v14 }
  0x63   : > { %782 = vmatpush1.msra.mxu1 %v1535_v15 }
  0x64   : > { %783 = vmatprep.subr.mxu1 %v1541_v17 }
  0x65   : > { %784 = vmatpush1.msra.mxu1 %v1548_v19 }
  0x66   : > { %785 = vmatprep.subr.mxu1 %v1550_v20 }
  0x67   : > { %786 = vmatpush1.msra.mxu1 %v1556_v22 }
  0x68   : > { %787 = vmatprep.subr.mxu1 %v1562_v24  ;;  %v1129_v24 = vld [vmem:[%s1818_s2] ss:$0 sm:$0xff] }
  0x69   : > { %788 = vmatpush1.msra.mxu1 %v1573_v26 }
  0x6a   : > { %789 = vmatprep.subr.mxu1 %v1579_v28 }
  0x6b   : > { %790 = vmatpush1.msra.mxu1 %v1585_v30 }
  0x6c   : > { %791 = vmatprep.subr.mxu1 %v1594_v35 }
  0x6d   : > { %792 = vmatpush1.msra.mxu1 %v1598_v36 }
  0x6e   : > { %793 = vmatprep.subr.mxu1 %v1604_v40  ;;  %v908_v40 = vld [vmem:[%s1821_s5 + $0x68] sm:$0xff] }
  0x6f   : > { %794 = vmatpush1.msra.mxu1 %v1607_v42  ;;  %1160 = vmatpush3.msra.mxu0 %v908_v40  ;;  %v906_v42 = vld [vmem:[%s1821_s5 + $0x58] sm:$0xff] }
  0x70   : > { %795 = vmatprep.subr.mxu1 %v1610_v44  ;;  %1161 = vmatprep.subr.mxu0 %v1376_v0  ;;  %v904_v44 = vld [vmem:[%s1821_s5 + $0x48] sm:$0xff] }
  0x71   : > { %796 = vmatpush1.msra.mxu1 %v1614_v49  ;;  %1162 = vmatpush3.msra.mxu0 %v907_v41  ;;  %v899_v49 = vld [vmem:[%s1821_s5 + $0x20] sm:$0xff] }
  0x72   : > { %1128 = vmatmul.mubr.msk.f32.vlgmr.msra.gmra.mxu1 %vm387_vm0, %v762_v1  ;;  %1163 = vmatprep.subr.mxu0 %v1376_v0 }
  0x73   : > { %1164 = vmatpush3.msra.mxu0 %v906_v42 }
  0x74   : > { %1165 = vmatprep.subr.mxu0 %v1376_v0 }
  0x75   : > { %1166 = vmatpush3.msra.mxu0 %v905_v43 }
  0x76   : > { %1167 = vmatprep.subr.mxu0 %v1376_v0 }
  0x77   : > { %1168 = vmatpush3.msra.mxu0 %v904_v44 }
  0x78   : > { %1169 = vmatprep.subr.mxu0 %v1376_v0 }
  0x79   : > { %1170 = vmatpush3.msra.mxu0 %v903_v45 }
  0x7a   : > { %1171 = vmatprep.subr.mxu0 %v1376_v0 }
  0x7b   : > { %1172 = vmatpush3.msra.mxu0 %v902_v46 }
  0x7c   : > { %1173 = vmatprep.subr.mxu0 %v1376_v0 }
  0x7d   : > { %1174 = vmatpush3.msra.mxu0 %v901_v47 }
  0x7e   : > { %1175 = vmatprep.subr.mxu0 %v1376_v0 }
  0x7f   : > { %1176 = vmatpush3.msra.mxu0 %v900_v48 }
  0x80   : > { %1177 = vmatprep.subr.mxu0 %v1376_v0 }
  0x81   : > { %1178 = vmatpush3.msra.mxu0 %v899_v49 }
  0x82   : > { %1179 = vmatprep.subr.mxu0 %v1376_v0 }
  0x83   : > { %1180 = vmatpush3.msra.mxu0 %v898_v50 }
  0x84   : > { %1181 = vmatprep.subr.mxu0 %v1376_v0 }
  0x85   : > { %1182 = vmatpush3.msra.mxu0 %v897_v51 }
  0x86   : > { %1183 = vmatprep.subr.mxu0 %v1376_v0 }
  0x87   : > { %1184 = vmatpush3.msra.mxu0 %v896_v52 }
  0x88   : > { %1185 = vmatprep.subr.mxu0 %v1376_v0  ;;  %v1130_v0 = vld [vmem:[%s1819_s3] ss:$0 sm:$0xff] }
  0x89   : > { %1186 = vmatpush3.msra.mxu0 %v895_v53 }
  0xfc   : > { %v457_v2 = vpop.f32.mrf.mxu1 }
  0xfe   : > { %v459_v3 = vpop.f32.mrf.mxu1 }
 0x101   : > { %v609_v5 = vpop.f32.mrf.mxu0 }
 0x103   : > { %v611_v7 = vpop.f32.mrf.mxu0 }
 0x10e   : > { %v531_v4 = vpop.f32.mrf.mxu1 }
 0x10f   : > { %v532_v13 = vadd.f32 %v531_v4, %v457_v2  ;;  %v1131_v2 = vld [vmem:[%s1820_s4] ss:$0 sm:$0xff] }
 0x110   : > { %v533_v6 = vpop.f32.mrf.mxu1 }
 0x111   : > { %v534_v10 = vadd.f32 %v533_v6, %v459_v3  ;;  %v614_v19 = vadd.f32 %v609_v5, %v532_v13 }
 0x113   : > { %v615_v15 = vadd.f32 %v611_v7, %v534_v10 }
 0x115   : > { %v616_v22 = vmax.f32 %v614_v19, %v615_v15 }
 0x116   : > { %v754_v9 = vpop.f32.mrf.mxu0 }
 0x118   : > { %v756_v12 = vpop.f32.mrf.mxu0 }
 0x120   : > { %v683_v8 = vpop.f32.mrf.mxu1 }
 0x121   : > { %v755_v16 = vadd.f32 %v754_v9, %v683_v8 }
 0x122   : > { %v685_v11 = vpop.f32.mrf.mxu1 }
 0x123   : > { %v757_v17 = vadd.f32 %v756_v12, %v685_v11 }
 0x132   : > { %v831_v14 = vpop.f32.mrf.mxu1 }
 0x133   : > { %v836_v20 = vadd.f32 %v831_v14, %v755_v16 }
 0x134   : > { %v833_v18 = vpop.f32.mrf.mxu1 }
 0x135   : > { %v837_v21 = vadd.f32 %v833_v18, %v757_v17 }
 0x137   : > { %v838_v23 = vmax.f32 %v836_v20, %v837_v21 }
 0x139   : > { %v839_v25 = vmax.f32 %v616_v22, %v838_v23 }
 0x13b   : > { %v847_v26 = vadd.f32 %v1129_v24, %v839_v25 }
 0x13d   : > { %v848_v27 = vmax.f32 %v847_v26, 0.0 }
 0x13f   : > { %849 = vadd.xlane.f32.xlu0 %v848_v27 }
 0x1c8   : > { %v850_v28 = vpop.xlane.xlu0 %849 }
 0x1c9   : > { %v851_v29 = vrot.slane %v850_v28, 4 }
 0x1cb   : > { %v852_v30 = vadd.f32 %v851_v29, %v850_v28 }
 0x1cd   : > { %v853_v31 = vrot.slane %v852_v30, 2 }
 0x1cf   : > { %v854_v32 = vadd.f32 %v853_v31, %v852_v30 }
 0x1d1   : > { %v855_v33 = vrot.slane %v854_v32, 1 }
 0x1d3   : > { %v856_v34 = vadd.f32 %v855_v33, %v854_v32 }
 0x1d5   : > { %v857_v35 = vmul.f32 0.0009765625, %v856_v34 }
 0x1d7   : > { %v1676_v36 = vsub.f32 %v848_v27, %v857_v35 }
 0x1d9   : > { %v859_v37 = vmul.f32 %v1676_v36, %v1676_v36 }
 0x1db   : > { %860 = vadd.xlane.f32.xlu0 %v859_v37 }
 0x264   : > { %v861_v54 = vpop.xlane.xlu0 %860 }
 0x265   : > { %v862_v55 = vrot.slane %v861_v54, 4 }
 0x267   : > { %v863_v56 = vadd.f32 %v862_v55, %v861_v54 }
 0x269   : > { %v864_v57 = vrot.slane %v863_v56, 2 }
 0x26b   : > { %v865_v58 = vadd.f32 %v864_v57, %v863_v56 }
 0x26d   : > { %v866_v59 = vrot.slane %v865_v58, 1 }
 0x26f   : > { %v867_v60 = vadd.f32 %v866_v59, %v865_v58 }
 0x271   : > { %v868_v61 = vmul.f32 0.0009765625, %v867_v60 }
 0x273   : > { %v869_v62 = vadd.f32 1e-05, %v868_v61 }
 0x275   : > { %1249 = vrsqrt.f32 %v869_v62 }
 0x282   : > { %v1250_v63 = vpop.eup %1249 }
 0x283   : > { %v871_v1 = vmul.f32 %v1250_v63, %v1676_v36 }
 0x285   : > { %v879_v3 = vmul.f32 %v1130_v0, %v871_v1 }
 0x287   : > { %v887_v4 = vadd.f32 %v1131_v2, %v879_v3 }
 0x289   : > { %v889_v5 = vrot.slane %v887_v4, 4  ;;  %888 = vst [vmem:[%s317_s18] sm:$0xff] %v887_v4 }
 0x28b   : > { %v890_v6 = vadd.f32 %v889_v5, %v887_v4 }
 0x28d   : > { %v891_v7 = vrot.slane %v890_v6, 2 }
 0x28f   : > { %v892_v8 = vadd.f32 %v891_v7, %v890_v6 }
 0x291   : > { %v893_v9 = vrot.slane %v892_v8, 1 }
 0x293   : > { %v894_v10 = vadd.f32 %v893_v9, %v892_v8 }
 0x295   : > { %1188 = vmatmul.mubr.f32.vlgmr.msra.gmra.mxu0 %v894_v10 }
 0x296   : > { %1290 = shalt.err (!%p1287_p0)
}
 0x297   : > { %s1291_s17 = scalar_lea.hbm %s1000_s22, 128  ;;  %s1295_s20 = scalar_lea.hbm %s1823_s7, 256 }
 0x298   : > { %p1292_p1 = scmp.ne.s32.totalorder %s1000_s22, %s1291_s17  ;;  %p1296_p4 = scmp.lt.s32.totalorder %s1000_s22, %s1823_s7 }
 0x299   : > { %p1297_p7 = scmp.lt.s32.totalorder %s1295_s20, %s1291_s17 }
 0x29a   : > { %p1293_p2 = pnand %p1292_p1, %p1463_p5 }
 0x29b   : > { %p1298_p6 = por %p1297_p7, %p1296_p4 }
 0x29c   : > { %p1294_p3 = pneg %p1293_p2 }
 0x29e   : > { %p1299_p8 = pnand %p1298_p6, %p1294_p3 }
 0x2a0   : > { %1302 = shalt.err (!%p1299_p8)
}
 0x2a1   : > { %1194 = dma.vmem_to_hbm [thread:$0]  (%p1463_p5), %s1003_s23, 128, %s1000_s22, %s985_s24   ;;  %v911_v11 = vld [vmem:[%s1822_s6] sm:$0x1]  ;;  %vm982_vm3 = vcmask 73728  }
 0x2a2   : > { %s1134_s12 = sshll.u32 %s1446_s9, 4  ;;  %s323_s13 = scalar_lea.vmem [#allocation6], %s1745_s25 }
 0x2a3   : > { %s1015_s18 = sshll.u32 %s323_s13, 4  ;;  %s1780_s19 = scalar_lea.hbm %s1824_s8, %s1134_s12  ;;  %s1016_s18 = int_to_ptr.vmem [resolvable:$true] %s1015_s18 }
 0x2a4   : > { %s990_s20 = scalar_lea.sflag [#allocation7], %s1745_s25  ;;  %s1303_s22 = scalar_lea.vmem %s1016_s18, 16 }
 0x2a5   : > { %p1304_p9 = scmp.ne.s32.totalorder %s1016_s18, %s1303_s22  ;;  %s1379_s9 = smov [#allocation6]  }
 0x2a6   : > { %s1307_s23 = sshll.u32 %s1379_s9, 4  ;;  %s1308_s23 = int_to_ptr.vmem [resolvable:$false] %s1307_s23 }
 0x2a7   : > { %p1305_p10 = pnand %p1304_p9, %p1463_p5  ;;  %s1309_s24 = scalar_lea.vmem %s1308_s23, 32 }
 0x2a8   : > { %p1310_p12 = scmp.lt.s32.totalorder %s1016_s18, %s1308_s23  ;;  %p1311_p13 = scmp.lt.s32.totalorder %s1309_s24, %s1303_s22 }
 0x2a9   : > { %p1306_p11 = pneg %p1305_p10 }
 0x2aa   : > { %p1312_p0 = por %p1311_p13, %p1310_p12 }
 0x2ac   : > { %p1313_p1 = pnand %p1312_p0, %p1306_p11 }
 0x355   : > { %v978_v12 = vpop.f32.mrf.mxu0 }
 0x356   : > { %v979_v13 = vadd.f32 %v978_v12, %v911_v11 }
 0x357   : > { %v1189_v14 = vpop.f32.mrf.mxu0 }
 0x358   : > { %983 = vst.msk [vmem:[%s323_s13] sm:$0x1] %vm982_vm3, %v979_v13 }
 0x359   : > { %1316 = shalt.err (!%p1313_p1)
}
 0x35a   : > { %s1317_s21 = scalar_lea.hbm %s1780_s19, 16  ;;  %s1321_s10 = scalar_lea.hbm %s1824_s8, 32 }
 0x35b   : > { %p1318_p2 = scmp.ne.s32.totalorder %s1780_s19, %s1317_s21  ;;  %p1322_p7 = scmp.lt.s32.totalorder %s1780_s19, %s1824_s8 }
 0x35c   : > { %p1323_p6 = scmp.lt.s32.totalorder %s1321_s10, %s1317_s21 }
 0x35d   : > { %p1319_p3 = pnand %p1318_p2, %p1463_p5 }
 0x35e   : > { %p1324_p8 = por %p1323_p6, %p1322_p7 }
 0x35f   : > { %p1320_p4 = pneg %p1319_p3 }
 0x361   : > { %p1325_p9 = pnand %p1324_p8, %p1320_p4 }
 0x363   : > { %1328 = shalt.err (!%p1325_p9)
}
 0x364   : > { %1195 = dma.vmem_to_hbm [thread:$0]  (%p1463_p5), %s1016_s18, 16, %s1780_s19, %s990_s20  }
 0x365 PF: > { %p1211_p10 = scmp.ge.s32.totalorder %s1371_s30, 2  ;;  %s1027_s0 = sand.u32 1, %s1359_s27  }
 0x366   : > { %p1830_p11 = scmp.ne.s32.totalorder %s1827_s16, 0  ;;  %s1028_s17 = scalar_lea.sflag [#allocation4], %s1027_s0 }
 0x368   : > { %p1203_p12 = pnand %p1211_p10, %p1830_p11 }
 0x36a   : > { %p1204_p13 = pneg %p1203_p12 }
 0x36c   : > { %1350 = dma.done.wait (%p1204_p13), %s1028_s17, 128  }
 0x36d   : > { %1352 = vsyncadd (%p1204_p13), %s1028_s17, 4294967168  ;;  %s1037_s22 = scalar_lea.sflag [#allocation7], %s1027_s0 }
 0x36e   : > { %1354 = dma.done.wait (%p1204_p13), %s1037_s22, 16  }
 0x36f   : > { %1356 = vsyncadd (%p1204_p13), %s1037_s22, 4294967280  ;;  %p23_p5 = scmp.ge.s32.totalorder %s1450_s11, 4   ;;  %s1831_s27 = smov %s1363_s28 }
 0x370   : > { %s1832_s28 = smov %s1367_s29  ;;  %s1833_s29 = smov %s1461_s14 }
 0x371   : > { %s1834_s30 = smov %s1450_s11  ;;  %25 = sbr.rel (!%p23_p5) target bundleno = 8 (0x8), region = 105 }
 0x376   :  { %1041 = vsyncpa [#allocation3], 1 }
 0x377   :  { %1043 = vsyncpa [#allocation3 + $0x1], 1 }
 0x378   :  { %1044 = vsyncpa [#allocation4], 1 }
 0x379   :  { %1046 = vsyncpa [#allocation4 + $0x1], 1 }
 0x37a   :  { %1047 = vsyncpa [#allocation7], 1 }
 0x37b   :  { %1049 = vsyncpa [#allocation7 + $0x1], 1 }

</bundles_post_ra>
